<compile_context>
chip_gen: v7x
topology: tpu7x:2x2x1
jax: 0.10.0
libtpu: 0.0.40
codegen_flags: <defaults>
</compile_context>

<pallas_src>
import math

import jax
import jax.numpy as jnp
from jax.experimental import pallas as pl
from jax.experimental.pallas import tpu as pltpu


def _round_up(x: int, m: int) -> int:
    return (x + m - 1) // m * m


def _vmem_cap_bytes() -> int:
    """Generation-aware VMEM budget cap (bytes)."""
    default = 48 << 20  # safe on every generation, incl. v7x (64 MiB physical)
    try:
        info = pltpu.get_tpu_info()
        phys = getattr(info, "vmem_capacity_bytes", None)
        if phys:
            if phys >= (128 << 20):          # v5e / v6e: 128 MiB physical
                return 100 << 20
            return min(default, max(32 << 20, int(phys) - (16 << 20)))
    except Exception:
        pass
    return default


# ----------------------------- kernels -------------------------------------


def _write_epilogue(z_f32, bias_row, a_ref, st_ref):
    """bias add (exactly once) + stats + ReLU store for one (tm, tn) tile."""
    z = z_f32 + bias_row                                   # f32
    # Two-stage reduction: lane (XLU) first, then sublane -> scalar.
    row_s = jnp.sum(z, axis=-1, keepdims=True)             # (tm, 1)
    row_s2 = jnp.sum(z * z, axis=-1, keepdims=True)        # (tm, 1)
    sum_z = jnp.sum(row_s)
    sum_z2 = jnp.sum(row_s2)
    # Pack both partial sums into one (8, 128) tile: sublane 0 = sum(z),
    # sublane 1 = sum(z^2); lanes hold the broadcast value (lane-dense store).
    rows = jax.lax.broadcasted_iota(jnp.int32, st_ref.shape, 0)
    st_ref[...] = jnp.where(rows == 0, sum_z,
                            jnp.where(rows == 1, sum_z2, 0.0))
    a_ref[...] = jnp.maximum(z, 0.0).astype(a_ref.dtype)


def _fullk_kernel(x_ref, w_ref, b_ref, a_ref, st_ref):
    """Single-K-block path: no accumulator scratch, no pl.when gating."""
    z = jnp.dot(x_ref[...], w_ref[...], preferred_element_type=jnp.float32)
    _write_epilogue(z, b_ref[...], a_ref, st_ref)


def _kloop_kernel(x_ref, w_ref, b_ref, a_ref, st_ref, acc_ref):
    """K-tiled path with f32 VMEM accumulator (overwrite at k==0)."""
    k = pl.program_id(2)
    prod = jnp.dot(x_ref[...], w_ref[...], preferred_element_type=jnp.float32)

    @pl.when(k == 0)
    def _init():
        acc_ref[...] = prod            # direct overwrite: no zero-init + add

    @pl.when(k > 0)
    def _accum():
        acc_ref[...] += prod

    @pl.when(k == pl.num_programs(2) - 1)
    def _finalize():
        _write_epilogue(acc_ref[...], b_ref[...], a_ref, st_ref)


# ----------------------------- forward --------------------------------------


def _vanilla_linear_forward(x, w_p, b_p, bias_sum, bias_sq_sum, *,
                            n_out, k_in, tm, tn_eff, tk_eff, k_pad, n_pad,
                            full_k, compute_dtype, out_dtype, vmem_cap):
    B, Kx = x.shape
    assert Kx == k_in, f"expected {k_in} input features, got {Kx}"

    tm_eff = min(tm, _round_up(B, 8))
    m_pad = _round_up(B, tm_eff)
    gm = m_pad // tm_eff
    gn = n_pad // tn_eff

    # Only cast / pad x when actually needed (no-op for aligned bf16 inputs).
    x_c = x.astype(compute_dtype) if x.dtype != compute_dtype else x
    if m_pad > B or k_pad > k_in:
        x_c = jnp.pad(x_c, ((0, m_pad - B), (0, k_pad - k_in)))

    itom = jnp.dtype(compute_dtype).itemsize
    out_shapes = (
        jax.ShapeDtypeStruct((m_pad, n_pad), out_dtype),          # relu(z) (padded)
        jax.ShapeDtypeStruct((gm * 8, gn * 128), jnp.float32),    # packed stats tiles
    )

    if full_k:
        grid = (gm, gn)
        in_specs = [
            pl.BlockSpec((tm_eff, k_pad), lambda i, j: (i, 0)),
            pl.BlockSpec((k_pad, tn_eff), lambda i, j: (0, j)),
            pl.BlockSpec((1, tn_eff), lambda i, j: (0, j)),
        ]
        out_specs = (
            pl.BlockSpec((tm_eff, tn_eff), lambda i, j: (i, j)),
            pl.BlockSpec((8, 128), lambda i, j: (i, j)),
        )
        scratch = []
        kernel = _fullk_kernel
        dims = ("parallel", "parallel")
        vmem_est = (2 * tm_eff * k_pad * itom + 2 * k_pad * tn_eff * itom
                    + 2 * tn_eff * 4 + 2 * tm_eff * tn_eff * 4
                    + 2 * 8 * 128 * 4
                    + tm_eff * tn_eff * 4)        # finalize z temp
    else:
        gk = k_pad // tk_eff
        grid = (gm, gn, gk)
        in_specs = [
            pl.BlockSpec((tm_eff, tk_eff), lambda i, j, k: (i, k)),
            pl.BlockSpec((tk_eff, tn_eff), lambda i, j, k: (k, j)),
            pl.BlockSpec((1, tn_eff), lambda i, j, k: (0, j)),
        ]
        out_specs = (
            pl.BlockSpec((tm_eff, tn_eff), lambda i, j, k: (i, j)),
            pl.BlockSpec((8, 128), lambda i, j, k: (i, j)),
        )
        scratch = [pltpu.VMEM((tm_eff, tn_eff), jnp.float32)]
        kernel = _kloop_kernel
        dims = ("parallel", "parallel", "arbitrary")
        vmem_est = (2 * tm_eff * tk_eff * itom + 2 * tk_eff * tn_eff * itom
                    + 2 * tn_eff * 4 + 2 * tm_eff * tn_eff * 4
                    + 2 * 8 * 128 * 4
                    + 2 * tm_eff * tn_eff * 4)    # acc scratch + finalize z temp

    vmem_limit = int(min(max(vmem_est + (8 << 20), 32 << 20), vmem_cap))

    a_p, st = pl.pallas_call(
        kernel,
        out_shape=out_shapes,
        grid_spec=pltpu.PrefetchScalarGridSpec(
            num_scalar_prefetch=0,
            grid=grid,
            in_specs=in_specs,
            out_specs=out_specs,
            scratch_shapes=scratch,
        ),
        compiler_params=pltpu.CompilerParams(
            dimension_semantics=dims,
            vmem_limit_bytes=vmem_limit,
        ),
    )(x_c, w_p, b_p)

    a = a_p[:B, :n_out]

    # Finish the tiny (gm x gn) stats reduction outside the kernel.
    # Sublane 0 of each tile = sum(z), sublane 1 = sum(z^2) (lane-broadcast).
    st4 = st.reshape(gm, 8, gn, 128)
    total_s = jnp.sum(st4[:, 0, :, 0])
    total_s2 = jnp.sum(st4[:, 1, :, 0])

    # Zero-padded batch rows produce z == bias exactly (zero x rows, f32 bias
    # add); subtract their contribution exactly. Padded N columns are all-zero
    # weight+bias, so they contribute nothing.
    pad_rows = m_pad - B
    if pad_rows:
        total_s = total_s - pad_rows * bias_sum
        total_s2 = total_s2 - pad_rows * bias_sq_sum

    n_elems = B * n_out
    mean_sq = total_s2 / n_elems           # == (z.pow(2).sum(1)/out_f).mean()
    mean = total_s / n_elems
    # E[z^2] - E[z]^2 (torch.var(unbiased=False)); clamp tiny negative values
    # from f32 cancellation. TODO(synk): Welford combine if |mean| >> std.
    var = jnp.maximum(mean_sq - mean * mean, 0.0)
    return a, mean_sq, var


# ----------------------------- module wrapper --------------------------------


def _init_linear_params(key, in_f, out_f, init_type):
    kw, kb = jax.random.split(key)
    zeros_b = jnp.zeros((out_f,), jnp.float32)
    if init_type == "he_normal":
        std = math.sqrt(2.0 / in_f)
        w = jax.random.normal(kw, (out_f, in_f), jnp.float32) * std
        b = zeros_b
    elif init_type == "glorot_normal":
        std = math.sqrt(2.0 / (in_f + out_f))
        w = jax.random.normal(kw, (out_f, in_f), jnp.float32) * std
        b = zeros_b
    elif init_type == "glorot_uniform":
        lim = math.sqrt(6.0 / (in_f + out_f))
        w = jax.random.uniform(kw, (out_f, in_f), jnp.float32, -lim, lim)
        b = zeros_b
    elif init_type == "he_uniform":
        lim = math.sqrt(6.0 / in_f)
        w = jax.random.uniform(kw, (out_f, in_f), jnp.float32, -lim, lim)
        b = zeros_b
    elif init_type == "he_truncated":
        std = math.sqrt(2.0 / in_f)
        w = jnp.clip(jax.random.normal(kw, (out_f, in_f), jnp.float32) * std,
                     -2.0 * std, 2.0 * std)
        b = zeros_b
    elif init_type == "bad_uniform":
        w = jax.random.uniform(kw, (out_f, in_f), jnp.float32, 0.1, 1.0)
        b = jax.random.uniform(kb, (out_f,), jnp.float32, 0.1, 1.0)
    else:  # torch nn.Linear default
        lim = 1.0 / math.sqrt(in_f)
        w = jax.random.uniform(kw, (out_f, in_f), jnp.float32, -lim, lim)
        b = jax.random.uniform(kb, (out_f,), jnp.float32, -lim, lim)
    return w, b


class VanillaLinearPallas:
    """JAX/Pallas equivalent of the PyTorch VanillaLinear module."""

    def __init__(self, key, in_features, out_features, init_type="he_normal", *,
                 tm=512, tn=512, tk=1024,
                 compute_dtype=jnp.bfloat16, out_dtype=jnp.float32):
        w, b = _init_linear_params(key, in_features, out_features, init_type)
        self.w_t = jnp.asarray(w.T)          # [K, N] f32, unpadded (reference)
        self.bias = b                        # [N]    f32, unpadded (reference)

        K, N = in_features, out_features
        vmem_cap = _vmem_cap_bytes()
        itom = jnp.dtype(compute_dtype).itemsize

        # --- N tiling (lane dim multiple of 128). Split so v7x's 2 TCs both
        # get work when the N axis would otherwise collapse to one block.
        n128 = _round_up(N, 128)
        tn_eff = min(tn, n128)
        if n128 // tn_eff < 2 and n128 >= 512:
            tn_eff = _round_up(n128 // 2, 128)
        n_pad = _round_up(N, tn_eff)

        # --- K tiling: full-K (gk == 1) when the whole reduction fits VMEM.
        fullk_vmem = (2 * tm * K * itom + 2 * K * tn_eff * itom
                      + 2 * tn_eff * 4 + 3 * tm * tn_eff * 4 + 2 * 8 * 128 * 4)
        full_k = fullk_vmem <= int(0.75 * vmem_cap)
        if full_k:
            tk_eff = K
            k_pad = K
        else:
            tk_eff = min(tk, _round_up(K, 128))
            k_pad = _round_up(K, tk_eff)

        # --- One-time padding / layout of the static params (free per call).
        w_p = jnp.pad(self.w_t, ((0, k_pad - K), (0, n_pad - N)))
        self.w_p = w_p.astype(compute_dtype)                  # [K_pad, N_pad]
        self.b_p = jnp.pad(b, (0, n_pad - N)).reshape(1, n_pad)  # f32
        self.bias_sum = jnp.sum(b)                              # for pad-row fix
        self.bias_sq_sum = jnp.sum(b * b)

        cfg = dict(n_out=N, k_in=K, tm=tm, tn_eff=tn_eff, tk_eff=tk_eff,
                   k_pad=k_pad, n_pad=n_pad, full_k=full_k,
                   compute_dtype=compute_dtype, out_dtype=out_dtype,
                   vmem_cap=vmem_cap)
        self._fwd = jax.jit(
            lambda x, w, bp, bs, bs2: _vanilla_linear_forward(x, w, bp, bs, bs2, **cfg))

        # Recorded stats (mirror the torch module's attributes).
        self.mean_squared_length = 0.0
        self.activation_variance = 0.0
        self.gradient_norm = 0.0

    def __call__(self, x):
        a, mean_sq, var = self._fwd(x, self.w_p, self.b_p,
                                    self.bias_sum, self.bias_sq_sum)
        # `.item()`-style host readback, matching the PyTorch module.
        self.mean_squared_length = float(mean_sq)
        self.activation_variance = float(var)
        return a

    def compute_gradient_info(self):
        # TODO(synk): weight-grad L2 norm is backward-pass state; not part of
        # this forward kernel.
        self.gradient_norm = 0.0


# ----------------------------- test -----------------------------------------

if __name__ == "__main__":
    key = jax.random.PRNGKey(0)
    k_x, k_w = jax.random.split(key)

    batch, in_features, out_features = 8, 32, 64
    x = jax.random.normal(k_x, (batch, in_features), dtype=jnp.float32)

    layer = VanillaLinearPallas(k_w, in_features, out_features, "he_normal")
    a = layer(x)
    jax.block_until_ready(a)

    # Pure-JAX reference using the same bf16 MXU inputs / f32 accumulation.
    z_ref = jnp.dot(x.astype(jnp.bfloat16), layer.w_t.astype(jnp.bfloat16),
                    preferred_element_type=jnp.float32) + layer.bias
    a_ref = jnp.maximum(z_ref, 0.0)
    msl_ref = float(jnp.mean(jnp.sum(z_ref ** 2, axis=1) / z_ref.shape[1]))
    var_ref = float(jnp.var(z_ref))

    assert a.shape == (batch, out_features)
    assert jnp.allclose(a, a_ref, atol=1e-2, rtol=1e-2), "activation mismatch"
    assert abs(layer.mean_squared_length - msl_ref) <= 1e-2 * max(1.0, abs(msl_ref)), \
        "mean_squared_length mismatch"
    assert abs(layer.activation_variance - var_ref) <= 1e-2 * max(1.0, abs(var_ref)), \
        "activation_variance mismatch"

    print("KERNEL_OK")
</pallas_src>

<mosaic_0001>
module attributes {stable_mosaic.version = 11 : i64} {
  func.func @_fullk_kernel(%arg0: i32, %arg1: i32, %arg2: memref<8x32xbf16, #tpu.memory_space<vmem>>, %arg3: memref<32x128xbf16, #tpu.memory_space<vmem>>, %arg4: memref<1x128xf32, #tpu.memory_space<vmem>>, %arg5: memref<8x128xf32, #tpu.memory_space<vmem>>, %arg6: memref<8x128xf32, #tpu.memory_space<vmem>>) attributes {dimension_semantics = [#tpu.dimension_semantics<parallel>, #tpu.dimension_semantics<parallel>], iteration_bounds = array<i64: 1, 1>, scalar_prefetch = 0 : i64, scratch_operands = 0 : i64, tpu.core_type = #tpu.core_type<tc>, window_params = [{transform_indices = @transform_0, window_bounds = array<i64: 8, 32>}, {transform_indices = @transform_1, window_bounds = array<i64: 32, 128>}, {transform_indices = @transform_2, window_bounds = array<i64: 1, 128>}, {transform_indices = @transform_3, window_bounds = array<i64: 8, 128>}, {transform_indices = @transform_4, window_bounds = array<i64: 8, 128>}]} {
    %c0 = arith.constant 0 : index
    %c0_0 = arith.constant 0 : index
    %0 = vector.load %arg2[%c0, %c0_0] : memref<8x32xbf16, #tpu.memory_space<vmem>>, vector<8x32xbf16>
    %c0_1 = arith.constant 0 : index
    %c0_2 = arith.constant 0 : index
    %1 = vector.load %arg3[%c0_1, %c0_2] : memref<32x128xbf16, #tpu.memory_space<vmem>>, vector<32x128xbf16>
    %cst = arith.constant dense<0.000000e+00> : vector<8x128xf32>
    %2 = tpu.matmul %0, %1, %cst {dimension_numbers = #tpu.dot_dimension_numbers<[1], [0], [0], [1], [0, 0, 1, 1], [], []>} : vector<8x32xbf16>, vector<32x128xbf16>, vector<8x128xf32> -> vector<8x128xf32>
    %c0_3 = arith.constant 0 : index
    %c0_4 = arith.constant 0 : index
    %3 = vector.load %arg4[%c0_3, %c0_4] : memref<1x128xf32, #tpu.memory_space<vmem>>, vector<1x128xf32>
    %4 = vector.broadcast %3 : vector<1x128xf32> to vector<8x128xf32>
    %5 = arith.addf %2, %4 : vector<8x128xf32>
    %cst_5 = arith.constant dense<0.000000e+00> : vector<8xf32>
    %6 = vector.multi_reduction <add>, %5, %cst_5 [1] : vector<8x128xf32> to vector<8xf32>
    %7 = vector.shape_cast %6 : vector<8xf32> to vector<8x1xf32>
    %8 = arith.mulf %5, %5 : vector<8x128xf32>
    %cst_6 = arith.constant dense<0.000000e+00> : vector<8xf32>
    %9 = vector.multi_reduction <add>, %8, %cst_6 [1] : vector<8x128xf32> to vector<8xf32>
    %10 = vector.shape_cast %9 : vector<8xf32> to vector<8x1xf32>
    %11 = vector.shape_cast %7 : vector<8x1xf32> to vector<1x8x1xf32>
    %cst_7 = arith.constant dense<0.000000e+00> : vector<1xf32>
    %12 = vector.multi_reduction <add>, %11, %cst_7 [1, 2] : vector<1x8x1xf32> to vector<1xf32>
    %13 = vector.shape_cast %12 : vector<1xf32> to vector<1x1x1xf32>
    %14 = vector.extract %13[0, 0, 0] : f32 from vector<1x1x1xf32>
    %15 = vector.shape_cast %10 : vector<8x1xf32> to vector<1x8x1xf32>
    %cst_8 = arith.constant dense<0.000000e+00> : vector<1xf32>
    %16 = vector.multi_reduction <add>, %15, %cst_8 [1, 2] : vector<1x8x1xf32> to vector<1xf32>
    %17 = vector.shape_cast %16 : vector<1xf32> to vector<1x1x1xf32>
    %18 = vector.extract %17[0, 0, 0] : f32 from vector<1x1x1xf32>
    %19 = tpu.iota {dimensions = array<i32: 0>} : vector<8x128xi32>
    %c0_i32 = arith.constant 0 : i32
    %20 = vector.broadcast %c0_i32 : i32 to vector<8x128xi32>
    %21 = arith.cmpi eq, %19, %20 : vector<8x128xi32>
    %c1_i32 = arith.constant 1 : i32
    %22 = vector.broadcast %c1_i32 : i32 to vector<8x128xi32>
    %23 = arith.cmpi eq, %19, %22 : vector<8x128xi32>
    %cst_9 = arith.constant 0.000000e+00 : f32
    %24 = vector.broadcast %18 : f32 to vector<8x128xf32>
    %25 = vector.broadcast %cst_9 : f32 to vector<8x128xf32>
    %26 = arith.select %23, %24, %25 : vector<8x128xi1>, vector<8x128xf32>
    %27 = vector.broadcast %14 : f32 to vector<8x128xf32>
    %28 = arith.select %21, %27, %26 : vector<8x128xi1>, vector<8x128xf32>
    %c0_10 = arith.constant 0 : index
    %c0_11 = arith.constant 0 : index
    %29 = vector.load %arg6[%c0_10, %c0_11] : memref<8x128xf32, #tpu.memory_space<vmem>>, vector<8x128xf32>
    tpu.vector_store %arg6[%c0_10, %c0_11], %28 {strides = array<i32>} : memref<8x128xf32, #tpu.memory_space<vmem>>, vector<8x128xf32>,
    %cst_12 = arith.constant 0.000000e+00 : f32
    %30 = vector.broadcast %cst_12 : f32 to vector<8x128xf32>
    %31 = arith.maximumf %5, %30 : vector<8x128xf32>
    %c0_13 = arith.constant 0 : index
    %c0_14 = arith.constant 0 : index
    %32 = vector.load %arg5[%c0_13, %c0_14] : memref<8x128xf32, #tpu.memory_space<vmem>>, vector<8x128xf32>
    tpu.vector_store %arg5[%c0_13, %c0_14], %31 {strides = array<i32>} : memref<8x128xf32, #tpu.memory_space<vmem>>, vector<8x128xf32>,
    return
  }
  func.func @transform_0(%arg0: i32, %arg1: i32) -> (i32, i32) {
    %c0_i32 = arith.constant 0 : i32
    %c0_i32_0 = arith.constant 0 : i32
    return %arg0, %c0_i32 : i32, i32
  }
  func.func @transform_1(%arg0: i32, %arg1: i32) -> (i32, i32) {
    %c0_i32 = arith.constant 0 : i32
    %c0_i32_0 = arith.constant 0 : i32
    return %c0_i32, %arg1 : i32, i32
  }
  func.func @transform_2(%arg0: i32, %arg1: i32) -> (i32, i32) {
    %c0_i32 = arith.constant 0 : i32
    %c0_i32_0 = arith.constant 0 : i32
    return %c0_i32, %arg1 : i32, i32
  }
  func.func @transform_3(%arg0: i32, %arg1: i32) -> (i32, i32) {
    %c0_i32 = arith.constant 0 : i32
    return %arg0, %arg1 : i32, i32
  }
  func.func @transform_4(%arg0: i32, %arg1: i32) -> (i32, i32) {
    %c0_i32 = arith.constant 0 : i32
    return %arg0, %arg1 : i32, i32
  }
}

</mosaic_0001>

<bundles_post_ra>
// kernel: _lambda_.1
= control target key start
LH: loop header
LB: loop body
LE: loop exit
PB: predicated region body
PF: predicated region fallthrough
CT: control target
= control target key end

     0   :  { %10 = vsyncpa [#allocation3], 0  ;;  %s295_s0 = inlined_call_operand.vmem [shape: bf16[8,32], index: 0, kind: input, shape index: {}]   ;;  %s296_s1 = inlined_call_operand.hbm [shape: bf16[32,128], index: 1, kind: input, shape index: {}]   ;;  %s297_s2 = inlined_call_operand.vmem [shape: f32[1,128], index: 2, kind: input, shape index: {}]   ;;  %s298_s3 = inlined_call_operand.hbm [shape: f32[8,128], index: 3, kind: output, shape index: {0}]   ;;  %s299_s4 = inlined_call_operand.vmem [shape: f32[8,128], index: 4, kind: output, shape index: {1}]  }
   0x1   :  { %11 = vsyncpa [#allocation4], 0  ;;  %s231_s15 = smov [#allocation2]   ;;  %s183_s19 = scalar_lea.hbm %s296_s1, 256 }
   0x2   :  { %s19_s16 = sshll.u32 %s231_s15, 4  ;;  %p184_p0 = scmp.ne.s32.totalorder %s296_s1, %s183_s19  ;;  %s20_s16 = int_to_ptr.vmem [resolvable:$true] %s19_s16 }
   0x3   :  { %p187_p1 = scmp.lt.u32.totalorder %s183_s19, %s296_s1 }
   0x5   :  { %p189_p2 = pnand %p187_p1, %p184_p0 }
   0x7   :  { %192 = shalt.err (!%p189_p2)
}
   0x8   :  { %s193_s24 = scalar_lea.vmem %s20_s16, 256  ;;  %p198_p4 = scmp.lt.s32.totalorder %s20_s16, %s20_s16 }
   0x9   :  { %p194_p3 = scmp.ne.s32.totalorder %s20_s16, %s193_s24  ;;  %p199_p5 = scmp.lt.s32.totalorder %s193_s24, %s193_s24 }
   0xb   :  { %p200_p6 = por %p199_p5, %p198_p4 }
   0xd   :  { %p201_p7 = pnand %p200_p6, %p194_p3 }
   0xf   :  { %204 = shalt.err (!%p201_p7)
}
  0x10   :  { %s232_s25 = smov 64   ;;  %s233_s26 = smov 4  }
  0x11   :  { %25 = dma.hbm_to_vmem [thread:$0]  %s296_s1, 256, %s20_s16, [#allocation3], %s232_s25, %s232_s25, %s233_s26  }
  0x12   :  { %227 = dma.done.wait [#allocation3], 256  }
  0x13   :  { %228 = vsyncadd [#allocation3], 4294967040  ;;  %v234_v0 = vmov 0.0   ;;  %vm235_vm0 = vmmov 0   ;;  %v181_v1 = vld [vmem:[#allocation2] sm:$0xff]   ;;  %v182_v2 = vld [vmem:[#allocation2 + $0x8] sm:$0xff]  }
  0x14   :  { %163 = vmatprep.subr.bf16.mxu0 %v234_v0  ;;  %167 = vmatprep.mubr.msk.bf16.mxu0 %vm235_vm0, %v234_v0  ;;  %v32_v3 = vld [vmem:[%s295_s0] sm:$0xf]  ;;  %vm56_vm1 = vcmask 261120   ;;  %vm105_vm2 = vcmask 7168   ;;  %s236_s0 = smov [#allocation5]  }
  0x15   :  { %164 = vmatpush3.bf16.msra.mxu0 %v181_v1  ;;  %v156_v4 = vld [vmem:[%s297_s2] ss:$0 sm:$0xff]  ;;  %s143_s1 = sshll.u32 %s236_s0, 4  ;;  %s144_s1 = int_to_ptr.vmem [resolvable:$true] %s143_s1 }
  0x16   :  { %165 = vmatprep.subr.bf16.mxu0 %v234_v0  ;;  %s205_s2 = scalar_lea.vmem %s144_s1, 128  ;;  %p210_p9 = scmp.lt.s32.totalorder %s144_s1, %s144_s1 }
  0x17   :  { %p206_p8 = scmp.ne.s32.totalorder %s144_s1, %s205_s2  ;;  %p211_p10 = scmp.lt.s32.totalorder %s205_s2, %s205_s2 }
  0x19   :  { %166 = vmatpush3.bf16.msra.mxu0 %v182_v2  ;;  %p212_p11 = por %p211_p10, %p210_p9 }
  0x1b   :  { %p213_p12 = pnand %p212_p11, %p206_p8 }
  0x1c   :  { %168 = vmatmul.mubr.msk.bf16.vlgmr.msra.gmra.mrb[0].mxu0 %vm56_vm1, %v32_v3 }
  0xef   :  { %v94_v5 = vpop.f32.mrb[0].mxu0 }
  0xf0   :  { %v95_v6 = vadd.f32 %v156_v4, %v94_v5  ;;  %v169_v7 = vpop.f32.mrb[1].mxu0 }
  0xf1   :  { %v97_v8 = vpop.f32.mrb[2].mxu0 }
  0xf2   :  { %100 = vadd.xlane.f32.xlu0 %v95_v6  ;;  %v170_v9 = vpop.f32.mrb[3].mxu0  ;;  %v135_v10 = vmax.f32 %v95_v6, 0.0  ;;  %v102_v11 = vmul.f32 %v95_v6, %v95_v6 }
  0xf4   :  { %136 = vst [vmem:[#allocation5] sm:$0xff] %v135_v10 }
  0xf6   :  { %103 = vadd.xlane.f32.xlu0 %v102_v11 }
 0x17f   :  { %v101_v12 = vpop.xlane.xlu0 %100 }
 0x180   :  { %v106_v13 = vsel %vm105_vm2, %v101_v12, 0.0 }
 0x181   :  { %107 = vadd.xlane.f32.xlu1 %v106_v13 }
 0x183   :  { %v104_v14 = vpop.xlane.xlu0 %103 }
 0x184   :  { %v116_v15 = vsel %vm105_vm2, %v104_v14, 0.0 }
 0x185   :  { %117 = vadd.xlane.f32.xlu1 %v116_v15 }
 0x186   :  { %216 = shalt.err (!%p213_p12)
}
 0x187   :  { %s217_s9 = scalar_lea.hbm %s298_s3, 128 }
 0x188   :  { %p218_p13 = scmp.ne.s32.totalorder %s298_s3, %s217_s9  ;;  %p221_p0 = scmp.lt.u32.totalorder %s217_s9, %s298_s3 }
 0x18a   :  { %p223_p1 = pnand %p221_p0, %p218_p13 }
 0x18c   :  { %226 = shalt.err (!%p223_p1)
}
 0x18d   :  { %146 = dma.vmem_to_hbm [thread:$0]  %s144_s1, 128, %s298_s3, [#allocation4]   ;;  %v126_v30 = vlaneseq }
 0x18f   :  { %v127_v31 = vshrl.u32 %v126_v30, 7 }
 0x191   :  { %vm129_vm3 = vcmp.eq.s32.totalorder %v127_v31, 1  ;;  %vm128_vm4 = vcmp.eq.s32.totalorder %v127_v31, 0 }
 0x20e   :  { %v108_v16 = vpop.xlane.xlu1 %107 }
 0x20f   :  { %v109_v17 = vrot.slane %v108_v16, 4 }
 0x211   :  { %v110_v18 = vadd.f32 %v109_v17, %v108_v16 }
 0x212   :  { %v118_v19 = vpop.xlane.xlu1 %117 }
 0x213   :  { %v111_v20 = vrot.slane %v110_v18, 2  ;;  %v119_v21 = vrot.slane %v118_v19, 4 }
 0x215   :  { %v120_v22 = vadd.f32 %v119_v21, %v118_v19  ;;  %v112_v23 = vadd.f32 %v111_v20, %v110_v18 }
 0x217   :  { %v121_v24 = vrot.slane %v120_v22, 2  ;;  %v113_v25 = vrot.slane %v112_v23, 1 }
 0x219   :  { %v122_v26 = vadd.f32 %v121_v24, %v120_v22  ;;  %v114_v27 = vadd.f32 %v113_v25, %v112_v23 }
 0x21b   :  { %171 = vpush %v114_v27  ;;  %v123_v28 = vrot.slane %v122_v26, 1 }
 0x21d   :  { %v124_v29 = vadd.f32 %v123_v28, %v122_v26 }
 0x21f   :  { %173 = vpush %v124_v29 }
 0x24c   :  { %s172_s16 = spop %171 }
 0x24d   :  { %v132_v33 = vstv %s172_s16 }
 0x250   :  { %s174_s3 = spop %173 }
 0x251   :  { %v130_v32 = vstv %s174_s3 }
 0x252   :  { %v131_v34 = vsel %vm129_vm3, %v130_v32, 0.0 }
 0x253   :  { %v133_v35 = vsel %vm128_vm4, %v132_v33, %v131_v34 }
 0x254   :  { %134 = vst [vmem:[%s299_s4] sm:$0xff] %v133_v35 }
 0x255   :  { %229 = dma.done.wait [#allocation4], 128  }
 0x256   :  { %230 = vsyncadd [#allocation4], 4294967168 }
 0x257   :  { %154 = vsyncpa [#allocation3], 1 }
 0x258   :  { %155 = vsyncpa [#allocation4], 1 }

</bundles_post_ra>
